<compile_context>
chip_gen: v5e
topology: v5e:2x2
jax: 0.10.0
libtpu: 0.0.40
codegen_flags: <defaults>
</compile_context>

<pallas_src>
import math
import functools

import jax
import jax.numpy as jnp
from jax import lax
from jax.experimental import pallas as pl
from jax.experimental.pallas import tpu as pltpu


HIDDEN = 32  # fixed by the PyTorch module (nn.Linear(input_size, 32))


def _round_up(x, m):
    return ((x + m - 1) // m) * m


def _metak_kernel(x_ref, w1t_ref, b1_ref, w2t_ref, b2_ref, o_ref, *, n_valid):
    # Layer 1: relu(x @ W1^T + b1)   (W1 pre-transposed -> plain matmul)
    x = x_ref[...].astype(jnp.bfloat16)
    h = jnp.dot(x, w1t_ref[...], preferred_element_type=jnp.float32)
    h = jnp.maximum(h + b1_ref[...], 0.0)

    # Layer 2 logits: h @ W2^T + b2  (W2 pre-transposed + lane-padded to 128*k)
    logits = jnp.dot(h.astype(jnp.bfloat16), w2t_ref[...],
                     preferred_element_type=jnp.float32)
    logits = logits + b2_ref[...]

    # Mask padded output lanes so they contribute 0 probability mass.
    n_pad = logits.shape[-1]
    if n_pad != n_valid:  # static python branch
        col = lax.broadcasted_iota(jnp.int32, logits.shape, 1)
        logits = jnp.where(col < n_valid, logits, -jnp.inf)

    # Numerically-stable softmax over the last dim.
    m = jnp.max(logits, axis=-1, keepdims=True)
    e = jnp.exp(logits - m)
    s = jnp.sum(e, axis=-1, keepdims=True)
    o_ref[...] = (e * pl.reciprocal(s)).astype(o_ref.dtype)


@functools.partial(jax.jit, static_argnames=("output_size",))
def metak_forward(x, w1t, b1, w2t, b2, *, output_size):
    """x: [B, input_size] f32.
       w1t: [input_size, 32] bf16, b1: [1, 32] f32.
       w2t: [32, N_pad] bf16 (N_pad = round_up(output_size, 128), zero-padded cols),
       b2:  [1, N_pad] f32 (zero-padded)."""
    B, K = x.shape
    H = w1t.shape[1]
    NP = w2t.shape[1]

    # Batch tile: multiple of 8 sublanes, up to 128 rows; grid axis is "parallel"
    # so v7x's two TensorCores each take a share when the batch is large.
    tm = min(128, _round_up(B, 8))
    b_pad = _round_up(B, tm)
    if b_pad != B:
        x = jnp.pad(x, ((0, b_pad - B), (0, 0)))

    kernel = functools.partial(_metak_kernel, n_valid=output_size)

    out = pl.pallas_call(
        kernel,
        out_shape=jax.ShapeDtypeStruct((b_pad, NP), jnp.float32),
        grid_spec=pltpu.PrefetchScalarGridSpec(
            num_scalar_prefetch=0,
            grid=(b_pad // tm,),
            in_specs=[
                pl.BlockSpec((tm, K), lambda i: (i, 0)),   # x batch tile
                pl.BlockSpec((K, H), lambda i: (0, 0)),    # W1^T (resident)
                pl.BlockSpec((1, H), lambda i: (0, 0)),    # b1
                pl.BlockSpec((H, NP), lambda i: (0, 0)),   # W2^T padded (resident)
                pl.BlockSpec((1, NP), lambda i: (0, 0)),   # b2 padded
            ],
            out_specs=pl.BlockSpec((tm, NP), lambda i: (i, 0)),  # lane-dense (NP % 128 == 0)
        ),
        compiler_params=pltpu.CompilerParams(
            dimension_semantics=("parallel",),
        ),
        # TODO(synk): when input_size / batch scale up, add a k-axis ("arbitrary",
        # last) with a VMEM f32 accumulator and re-derive tiles for v7x's 64 MiB VMEM.
    )(x, w1t, b1, w2t, b2)

    return out[:B, :output_size]


def init_metak_params(key, input_size, output_size):
    """Matches MetaKNetwork.reset_parameters() (PyTorch [out, in] layout, f32):
       kaiming_uniform_(a=sqrt(5)) -> U(-1/sqrt(fan_in), 1/sqrt(fan_in)) for weights,
       bias ~ U(-1/sqrt(fan_in), 1/sqrt(fan_in))."""
    k1w, k1b, k2w, k2b = jax.random.split(key, 4)
    b1_bound = 1.0 / math.sqrt(input_size)
    w1 = jax.random.uniform(k1w, (HIDDEN, input_size), jnp.float32,
                            minval=-b1_bound, maxval=b1_bound)
    b1 = jax.random.uniform(k1b, (HIDDEN,), jnp.float32,
                            minval=-b1_bound, maxval=b1_bound)
    b2_bound = 1.0 / math.sqrt(HIDDEN)
    w2 = jax.random.uniform(k2w, (output_size, HIDDEN), jnp.float32,
                            minval=-b2_bound, maxval=b2_bound)
    b2 = jax.random.uniform(k2b, (output_size,), jnp.float32,
                            minval=-b2_bound, maxval=b2_bound)
    return w1, b1, w2, b2


def prepare_metak_params(w1, b1, w2, b2):
    """One-time prep (NOT per forward): transpose to [in, out], pad the output
       dim to a multiple of 128 lanes, cast matmul weights to bf16."""
    output_size = w2.shape[0]
    n_pad = _round_up(output_size, 128)

    w1t = jnp.asarray(w1.T, dtype=jnp.bfloat16)              # [K, 32]
    b1p = jnp.asarray(b1.reshape(1, HIDDEN), dtype=jnp.float32)

    w2t = jnp.zeros((HIDDEN, n_pad), jnp.float32).at[:, :output_size].set(w2.T)
    w2t = jnp.asarray(w2t, dtype=jnp.bfloat16)                # [32, n_pad]
    b2p = jnp.zeros((1, n_pad), jnp.float32).at[0, :output_size].set(b2)
    return w1t, b1p, w2t, b2p


def reference_forward(x, w1, b1, w2, b2):
    """Pure-JAX reference (eval-mode dropout = identity), same bf16-matmul /
       f32-accumulate numerics as the kernel."""
    h = jnp.dot(x.astype(jnp.bfloat16), w1.T.astype(jnp.bfloat16),
                preferred_element_type=jnp.float32) + b1
    h = jnp.maximum(h, 0.0)
    logits = jnp.dot(h.astype(jnp.bfloat16), w2.T.astype(jnp.bfloat16),
                     preferred_element_type=jnp.float32) + b2
    return jax.nn.softmax(logits, axis=-1)


if __name__ == "__main__":
    key = jax.random.PRNGKey(0)
    k_x, k_p = jax.random.split(key)

    batch, input_size, output_size = 8, 64, 16
    x = jax.random.normal(k_x, (batch, input_size), jnp.float32)

    w1, b1, w2, b2 = init_metak_params(k_p, input_size, output_size)
    w1t, b1p, w2t, b2p = prepare_metak_params(w1, b1, w2, b2)  # once, at init time

    out = metak_forward(x, w1t, b1p, w2t, b2p, output_size=output_size)
    out = jax.block_until_ready(out)

    ref = reference_forward(x, w1, b1, w2, b2)

    assert out.shape == (batch, output_size)
    assert jnp.allclose(out, ref, atol=2e-3, rtol=0), "mismatch vs reference"
    assert jnp.allclose(jnp.sum(out, axis=-1), 1.0, atol=1e-3), "softmax rows must sum to 1"

    print("KERNEL_OK")
</pallas_src>

<mosaic_0001>
module attributes {stable_mosaic.version = 11 : i64} {
  func.func @_metak_kernel(%arg0: i32, %arg1: memref<8x64xf32, #tpu.memory_space<vmem>>, %arg2: memref<64x32xbf16, #tpu.memory_space<vmem>>, %arg3: memref<1x32xf32, #tpu.memory_space<vmem>>, %arg4: memref<32x128xbf16, #tpu.memory_space<vmem>>, %arg5: memref<1x128xf32, #tpu.memory_space<vmem>>, %arg6: memref<8x128xf32, #tpu.memory_space<vmem>>) attributes {dimension_semantics = [#tpu.dimension_semantics<parallel>], iteration_bounds = array<i64: 1>, scalar_prefetch = 0 : i64, scratch_operands = 0 : i64, tpu.core_type = #tpu.core_type<tc>, window_params = [{transform_indices = @transform_0, window_bounds = array<i64: 8, 64>}, {pipeline_mode = #tpu.pipeline_mode<synchronous>, transform_indices = @transform_1, window_bounds = array<i64: 64, 32>}, {pipeline_mode = #tpu.pipeline_mode<synchronous>, transform_indices = @transform_2, window_bounds = array<i64: 1, 32>}, {pipeline_mode = #tpu.pipeline_mode<synchronous>, transform_indices = @transform_3, window_bounds = array<i64: 32, 128>}, {pipeline_mode = #tpu.pipeline_mode<synchronous>, transform_indices = @transform_4, window_bounds = array<i64: 1, 128>}, {transform_indices = @transform_5, window_bounds = array<i64: 8, 128>}]} {
    %c0 = arith.constant 0 : index
    %c0_0 = arith.constant 0 : index
    %0 = vector.load %arg1[%c0, %c0_0] : memref<8x64xf32, #tpu.memory_space<vmem>>, vector<8x64xf32>
    %1 = arith.truncf %0 : vector<8x64xf32> to vector<8x64xbf16>
    %c0_1 = arith.constant 0 : index
    %c0_2 = arith.constant 0 : index
    %2 = vector.load %arg2[%c0_1, %c0_2] : memref<64x32xbf16, #tpu.memory_space<vmem>>, vector<64x32xbf16>
    %cst = arith.constant dense<0.000000e+00> : vector<8x32xf32>
    %3 = tpu.matmul %1, %2, %cst {dimension_numbers = #tpu.dot_dimension_numbers<[1], [0], [0], [1], [0, 0, 1, 1], [], []>} : vector<8x64xbf16>, vector<64x32xbf16>, vector<8x32xf32> -> vector<8x32xf32>
    %c0_3 = arith.constant 0 : index
    %c0_4 = arith.constant 0 : index
    %4 = vector.load %arg3[%c0_3, %c0_4] : memref<1x32xf32, #tpu.memory_space<vmem>>, vector<1x32xf32>
    %5 = vector.broadcast %4 : vector<1x32xf32> to vector<8x32xf32>
    %6 = arith.addf %3, %5 : vector<8x32xf32>
    %cst_5 = arith.constant 0.000000e+00 : f32
    %7 = vector.broadcast %cst_5 : f32 to vector<8x32xf32>
    %8 = arith.maximumf %6, %7 : vector<8x32xf32>
    %9 = arith.truncf %8 : vector<8x32xf32> to vector<8x32xbf16>
    %c0_6 = arith.constant 0 : index
    %c0_7 = arith.constant 0 : index
    %10 = vector.load %arg4[%c0_6, %c0_7] : memref<32x128xbf16, #tpu.memory_space<vmem>>, vector<32x128xbf16>
    %cst_8 = arith.constant dense<0.000000e+00> : vector<8x128xf32>
    %11 = tpu.matmul %9, %10, %cst_8 {dimension_numbers = #tpu.dot_dimension_numbers<[1], [0], [0], [1], [0, 0, 1, 1], [], []>} : vector<8x32xbf16>, vector<32x128xbf16>, vector<8x128xf32> -> vector<8x128xf32>
    %c0_9 = arith.constant 0 : index
    %c0_10 = arith.constant 0 : index
    %12 = vector.load %arg5[%c0_9, %c0_10] : memref<1x128xf32, #tpu.memory_space<vmem>>, vector<1x128xf32>
    %13 = vector.broadcast %12 : vector<1x128xf32> to vector<8x128xf32>
    %14 = arith.addf %11, %13 : vector<8x128xf32>
    %15 = tpu.iota {dimensions = array<i32: 1>} : vector<8x128xi32>
    %c16_i32 = arith.constant 16 : i32
    %16 = vector.broadcast %c16_i32 : i32 to vector<8x128xi32>
    %17 = arith.cmpi slt, %15, %16 : vector<8x128xi32>
    %cst_11 = arith.constant 0xFF800000 : f32
    %18 = vector.broadcast %cst_11 : f32 to vector<8x128xf32>
    %19 = arith.select %17, %14, %18 : vector<8x128xi1>, vector<8x128xf32>
    %cst_12 = arith.constant dense<0xFF800000> : vector<8xf32>
    %20 = vector.multi_reduction <maximumf>, %19, %cst_12 [1] : vector<8x128xf32> to vector<8xf32>
    %21 = vector.shape_cast %20 : vector<8xf32> to vector<8x1xf32>
    %22 = vector.broadcast %21 : vector<8x1xf32> to vector<8x128xf32>
    %23 = arith.subf %19, %22 : vector<8x128xf32>
    %24 = math.exp %23 : vector<8x128xf32>
    %cst_13 = arith.constant dense<0.000000e+00> : vector<8xf32>
    %25 = vector.multi_reduction <add>, %24, %cst_13 [1] : vector<8x128xf32> to vector<8xf32>
    %26 = vector.shape_cast %25 : vector<8xf32> to vector<8x1xf32>
    %27 = tpu.reciprocal %26 : vector<8x1xf32> -> vector<8x1xf32>
    %28 = vector.broadcast %27 : vector<8x1xf32> to vector<8x128xf32>
    %29 = arith.mulf %24, %28 : vector<8x128xf32>
    %c0_14 = arith.constant 0 : index
    %c0_15 = arith.constant 0 : index
    %30 = vector.load %arg6[%c0_14, %c0_15] : memref<8x128xf32, #tpu.memory_space<vmem>>, vector<8x128xf32>
    tpu.vector_store %arg6[%c0_14, %c0_15], %29 {strides = array<i32>} : memref<8x128xf32, #tpu.memory_space<vmem>>, vector<8x128xf32>,
    return
  }
  func.func @transform_0(%arg0: i32) -> (i32, i32) {
    %c0_i32 = arith.constant 0 : i32
    %c0_i32_0 = arith.constant 0 : i32
    return %arg0, %c0_i32 : i32, i32
  }
  func.func @transform_1(%arg0: i32) -> (i32, i32) {
    %c0_i32 = arith.constant 0 : i32
    %c0_i32_0 = arith.constant 0 : i32
    %c0_i32_1 = arith.constant 0 : i32
    return %c0_i32, %c0_i32_0 : i32, i32
  }
  func.func @transform_2(%arg0: i32) -> (i32, i32) {
    %c0_i32 = arith.constant 0 : i32
    %c0_i32_0 = arith.constant 0 : i32
    %c0_i32_1 = arith.constant 0 : i32
    return %c0_i32, %c0_i32_0 : i32, i32
  }
  func.func @transform_3(%arg0: i32) -> (i32, i32) {
    %c0_i32 = arith.constant 0 : i32
    %c0_i32_0 = arith.constant 0 : i32
    %c0_i32_1 = arith.constant 0 : i32
    return %c0_i32, %c0_i32_0 : i32, i32
  }
  func.func @transform_4(%arg0: i32) -> (i32, i32) {
    %c0_i32 = arith.constant 0 : i32
    %c0_i32_0 = arith.constant 0 : i32
    %c0_i32_1 = arith.constant 0 : i32
    return %c0_i32, %c0_i32_0 : i32, i32
  }
  func.func @transform_5(%arg0: i32) -> (i32, i32) {
    %c0_i32 = arith.constant 0 : i32
    %c0_i32_0 = arith.constant 0 : i32
    return %arg0, %c0_i32 : i32, i32
  }
}

</mosaic_0001>

<bundles_post_ra>
// kernel: metak_forward.1
= control target key start
LH: loop header
LB: loop body
LE: loop exit
PB: predicated region body
PF: predicated region fallthrough
CT: control target
= control target key end

     0   :  { %s285_s0 = inlined_call_operand.vmem [shape: f32[8,64], index: 0, kind: input, shape index: {}]   ;;  %s286_s1 = inlined_call_operand.vmem [shape: bf16[64,32], index: 1, kind: input, shape index: {}]   ;;  %s287_s2 = inlined_call_operand.vmem [shape: f32[1,32], index: 2, kind: input, shape index: {}]   ;;  %s288_s3 = inlined_call_operand.vmem [shape: bf16[32,128], index: 3, kind: input, shape index: {}]   ;;  %s289_s4 = inlined_call_operand.vmem [shape: f32[1,128], index: 4, kind: input, shape index: {}]   ;;  %s290_s5 = inlined_call_operand.hbm [shape: f32[8,128], index: 5, kind: output, shape index: {}]  }
   0x1   :  { %v188_v0 = vld [vmem:[%s286_s1 + $0x18] sm:$0xff]  ;;  %v187_v1 = vld [vmem:[%s286_s1 + $0x10] sm:$0xff] }
   0x2   :  { %68 = vmatpush.bf16.msra.mxu0 %v188_v0 }
   0x3   :  { %10 = vsyncpa [#allocation3], 0  ;;  %v186_v2 = vld [vmem:[%s286_s1 + $0x8] sm:$0xff]  ;;  %v185_v3 = vld [vmem:[%s286_s1] sm:$0xff]  ;;  %vm60_vm0 = vcmask 523264   ;;  %vm99_vm1 = vcmask 261120   ;;  %v116_v14 = vlaneseq }
   0x4   :  { %v22_v4 = vld [vmem:[%s285_s0] sm:$0xff]  ;;  %v190_v6 = vld [vmem:[%s288_s3 + $0x8] sm:$0xff]  ;;  %s150_s10 = sshll.u32 %s290_s5, 4  ;;  %s151_s10 = int_to_ptr.hbm [resolvable:$true] %s150_s10 }
   0x5   :  { %v23_v5 = vpack.c.bf16 %v22_v4, %v22_v4  ;;  %109 = vmatpush.bf16.msra.mxu1 %v190_v6  ;;  %v189_v7 = vld [vmem:[%s288_s3] sm:$0xff]  ;;  %v117_v15 = vand.u32 127, %v116_v14 }
   0x6   :  { %69 = vmatpush.bf16.msra.mxu0 %v187_v1  ;;  %v192_v8 = vld [vmem:[%s287_s2] ss:$0 sm:$0xff]  ;;  %s224_s2 = smov [#allocation2]  }
   0x7   :  { %v193_v16 = vld [vmem:[%s289_s4] ss:$0 sm:$0xff]  ;;  %vm118_vm2 = vcmp.lt.s32.totalorder %v117_v15, 16  ;;  %s148_s3 = sshll.u32 %s224_s2, 4  ;;  %s149_s3 = int_to_ptr.vmem [resolvable:$true] %s148_s3 }
   0x9   :  { %110 = vmatpush.bf16.msra.mxu1 %v189_v7 }
   0xa   :  { %70 = vmatpush.bf16.msra.mxu0 %v186_v2 }
   0xe   :  { %71 = vmatpush.bf16.msra.mxu0 %v185_v3 }
  0x11   :  { %175 = vmatmul.msk.bf16.vlgmr.msra.gmra.mxu0 %vm60_vm0, %v23_v5 }
  0x8e   :  { %v73_v9 = vpop.f32.mrf.mxu0 }
  0x8f   :  { %v74_v10 = vadd.f32 %v192_v8, %v73_v9 }
  0x91   :  { %v77_v11 = vmax.f32 %v74_v10, 0.0 }
  0x93   :  { %v78_v12 = vpack.c.bf16 %v77_v11, %v77_v11 }
  0x95   :  { %184 = vmatmul.msk.bf16.vlgmr.msra.gmra.mxu1 %vm99_vm1, %v78_v12 }
  0x96   :  { %v75_v13 = vpop.f32.mrf.mxu0 }
 0x112   :  { %v112_v17 = vpop.f32.mrf.mxu1 }
 0x113   :  { %v113_v18 = vadd.f32 %v193_v16, %v112_v17 }
 0x115   :  { %v119_v19 = vsel %vm118_vm2, %v113_v18, -inf }
 0x116   :  { %120 = vmax.xlane.f32.xlu0 %v119_v19 }
 0x11a   :  { %v114_v20 = vpop.f32.mrf.mxu1 }
 0x189   :  { %v121_v21 = vpop.xlane.xlu0 %120 }
 0x18a   :  { %v122_v22 = vsub.f32 %v119_v19, %v121_v21 }
 0x18c   :  { %v123_v23 = vmul.f32 1.442695, %v122_v22 }
 0x18e   :  { %194 = vpow2.f32 %v123_v23 }
 0x194   :  { %v195_v24 = vpop.eup %194 }
 0x195   :  { %125 = vadd.xlane.f32.xlu0 %v195_v24 }
 0x208   :  { %v126_v25 = vpop.xlane.xlu0 %125 }
 0x209   :  { %196 = vrcp.f32 %v126_v25  ;;  %v138_v29 = vand.u32 2147483648, %v126_v25  ;;  %v136_v31 = vand.u32 2147483647, %v126_v25  ;;  %vm132_vm4 = vweird.f32 %v126_v25 }
 0x20b   :  { %v139_v33 = vor.u32 1.1754944e-38, %v138_v29  ;;  %vm137_vm6 = vcmp.eq.f32.partialorder %v136_v31, 8.507059e+37 }
 0x20f   :  { %v197_v26 = vpop.eup %196 }
 0x210   :  { %v128_v27 = vmul.f32 %v197_v26, %v126_v25  ;;  %vm133_vm3 = vweird.f32 %v197_v26 }
 0x211   :  { %vm134_vm5 = vmor %vm132_vm4, %vm133_vm3 }
 0x212   :  { %v129_v28 = vsub.f32 1.0, %v128_v27 }
 0x214   :  { %v130_v30 = vmul.f32 %v197_v26, %v129_v28 }
 0x216   :  { %v131_v32 = vadd.f32 %v197_v26, %v130_v30 }
 0x218   :  { %v135_v34 = vsel %vm134_vm5, %v197_v26, %v131_v32 }
 0x219   :  { %v140_v35 = vsel %vm137_vm6, %v139_v33, %v135_v34 }
 0x21a   :  { %v141_v36 = vmul.f32 %v195_v24, %v140_v35 }
 0x21c   :  { %142 = vst [vmem:[#allocation2] sm:$0xff] %v141_v36 }
 0x21d   :  { %153 = dma.vmem_to_hbm [thread:$0]  %s149_s3, 128, %s151_s10, [#allocation3]  }
 0x21e   :  { %222 = dma.done.wait [#allocation3], 128  }
 0x21f   :  { %223 = vsyncadd [#allocation3], 4294967168 }
 0x220   :  { %158 = vsyncpa [#allocation3], 1 }

</bundles_post_ra>
